<compile_context>
chip_gen: v6e
topology: v6e:2x2x1
jax: 0.10.0
libtpu: 0.0.40
codegen_flags: <defaults>
</compile_context>

<pallas_src>
import functools
import math

import jax
import jax.numpy as jnp
from jax import lax
from jax.experimental import pallas as pl
from jax.experimental.pallas import tpu as pltpu

K = 7     # conv kernel size
PAD = 3   # conv padding


def _pick_tile(total, limit):
    """Largest divisor of `total` that is <= `limit` (at least 1)."""
    t = max(1, min(total, int(limit)))
    while total % t:
        t -= 1
    return t


def _pad_up(v, m):
    return ((v + m - 1) // m) * m


def _vmem_capacity_bytes():
    try:
        return int(pltpu.get_tpu_info().vmem_capacity_bytes)
    except Exception:
        # Conservative fallback; the budgets below stay <= ~24 MiB total,
        # well inside v7x's 64 MiB physical VMEM anyway.
        return 128 << 20


# --------------- stage 1: fused channel max / mean (lane-dense) --------------

def _reduce_kernel(x_ref, max_ref, avg_ref, *, c_tile, c_total, unroll_limit=32):
    # x_ref   : (b_tile, c_tile, HW)  input block, HW on the lane axis
    # max_ref : (b_tile, 1, HW) f32   running channel max (resident across ci)
    # avg_ref : (b_tile, 1, HW) f32   running channel sum -> mean at last step
    ci = pl.program_id(1)
    nc = pl.num_programs(1)

    def plane(k):
        # One (b_tile, HW) channel plane; per-plane cast keeps the live range
        # bounded and avoids an f32 copy of the whole block for bf16 inputs.
        return x_ref[:, k, :].astype(jnp.float32)

    m = plane(0)
    s = m
    if c_tile <= unroll_limit:
        # Static unroll: each plane is loaded exactly once and feeds both the
        # max and the sum (single VMEM traversal).
        for k in range(1, c_tile):
            p = plane(k)
            m = jnp.maximum(m, p)
            s = s + p
    else:
        def body(k, carry):
            mm, ss = carry
            p = plane(k)
            return jnp.maximum(mm, p), ss + p
        m, s = lax.fori_loop(1, c_tile, body, (m, s))

    @pl.when(ci == 0)
    def _():
        max_ref[:, 0, :] = m
        avg_ref[:, 0, :] = s

    @pl.when(ci > 0)
    def _():
        max_ref[:, 0, :] = jnp.maximum(max_ref[:, 0, :], m)
        avg_ref[:, 0, :] = avg_ref[:, 0, :] + s

    @pl.when(ci == nc - 1)
    def _():
        avg_ref[:, 0, :] = avg_ref[:, 0, :] * (1.0 / c_total)


# --------------- stage 2: 7x7 conv over [max, avg] + sigmoid -----------------

def _conv_kernel(maxp_ref, avgp_ref, w_ref, b_ref, o_ref):
    # maxp_ref / avgp_ref : (b_tile2, H+6, W+6) f32 zero-padded pooled maps
    # w_ref : (2*K*K,) SMEM flat conv weight (index = cin*49 + kh*7 + kw;
    #         cin 0 = max channel, cin 1 = avg channel, matching torch.cat)
    # b_ref : (1,)     SMEM conv bias
    # o_ref : (b_tile2, H, W) f32
    b, h, w = o_ref.shape
    acc = jnp.full((b, h, w), b_ref[0], dtype=jnp.float32)
    for kh in range(K):
        # Slice the kh-shifted rows once per map, reuse across the 7 kw taps.
        row_m = maxp_ref[:, kh:kh + h, :]
        row_a = avgp_ref[:, kh:kh + h, :]
        for kw in range(K):
            acc = acc + w_ref[kh * K + kw] * row_m[:, :, kw:kw + w]
            acc = acc + w_ref[K * K + kh * K + kw] * row_a[:, :, kw:kw + w]
    # Exact sigmoid (this finalize touches ~1/C of the data; negligible).
    o_ref[...] = 1.0 / (1.0 + jnp.exp(-acc))


# ------------------------------ wrapper ---------------------------------------

def sam_forward(x, conv_w, conv_b, *, b_tile=None, c_tile=None):
    """x: (N, C, H, W); conv_w: (1, 2, 7, 7); conv_b: (1,). Returns (N, 1, H, W) f32."""
    n, c, h, w = x.shape
    hw = h * w
    hp, wp = h + 2 * PAD, w + 2 * PAD
    itemsize = jnp.dtype(x.dtype).itemsize

    # ---- layout-padded sizes (what VMEM actually holds) ----------------------
    sub_mult = 8 * max(1, 4 // itemsize)          # sublane tile: 8 f32 / 16 bf16 / 32 i8
    hw_pad = _pad_up(hw, 128)                     # lane-padded flattened spatial

    cap = _vmem_capacity_bytes()
    # Per-input-block budget: large enough to amortize the ~0.35 us/step grid
    # overhead, small enough that double-buffered inputs + resident outputs
    # stay comfortably inside every generation's VMEM (v7x: 64 MiB physical).
    per_buf_budget = max(2 << 20, min(10 << 20, cap // 6))

    # ---- batch tile: keep >= 2 "parallel" grid points (v7x megacore) ---------
    if b_tile is None:
        b_cap = n if n < 2 else max(1, n // 2)
        per_batch_min = sub_mult * hw_pad * itemsize       # one c-slab per image
        b_cap = min(b_cap, max(1, per_buf_budget // per_batch_min))
        b_tile = _pick_tile(n, b_cap)

    # ---- channel tile: divisor of C that is full C or sublane-aligned --------
    def _in_block_bytes(ct):
        return b_tile * _pad_up(ct, sub_mult) * hw_pad * itemsize

    if c_tile is None:
        cands = [d for d in range(1, c + 1)
                 if c % d == 0 and (d == c or d % sub_mult == 0)]
        fitting = [d for d in cands if _in_block_bytes(d) <= per_buf_budget]
        c_tile = max(fitting) if fitting else min(cands)
    assert n % b_tile == 0 and c % c_tile == 0
    assert c_tile == c or c_tile % sub_mult == 0, \
        "c_tile must equal C or be a multiple of the sublane tile"
    # TODO(synk): non-divisor N/C would need a cdiv grid with a masked last step.

    # ---- explicit scoped-VMEM limit from the padded estimate -----------------
    in_blk = _in_block_bytes(c_tile)                       # one input buffer
    out_blk = b_tile * 8 * hw_pad * 4                      # (b,1,HW) padded to 8 sublanes
    needed = 2 * in_blk + 4 * out_blk + (4 << 20)          # dbl-buffered in + 2 outs + headroom
    vmem_limit = int(min(max(needed, 16 << 20), max(cap - (8 << 20), 16 << 20)))

    x_flat = x.reshape(n, c, hw)                           # free row-major reshape

    reduce_kernel = functools.partial(
        _reduce_kernel, c_tile=c_tile, c_total=float(c))
    max_out, avg_out = pl.pallas_call(
        reduce_kernel,
        out_shape=(jax.ShapeDtypeStruct((n, 1, hw), jnp.float32),
                   jax.ShapeDtypeStruct((n, 1, hw), jnp.float32)),
        grid=(n // b_tile, c // c_tile),                   # reduction axis last
        in_specs=[pl.BlockSpec((b_tile, c_tile, hw), lambda bi, ci: (bi, ci, 0))],
        out_specs=(pl.BlockSpec((b_tile, 1, hw), lambda bi, ci: (bi, 0, 0)),
                   pl.BlockSpec((b_tile, 1, hw), lambda bi, ci: (bi, 0, 0))),
        compiler_params=pltpu.CompilerParams(
            dimension_semantics=("parallel", "arbitrary"),
            vmem_limit_bytes=vmem_limit,
        ),
    )(x_flat)

    # ---- tiny finalize: zero-pad pooled maps, 7x7 conv, sigmoid --------------
    maxp = jnp.pad(max_out.reshape(n, h, w), ((0, 0), (PAD, PAD), (PAD, PAD)))
    avgp = jnp.pad(avg_out.reshape(n, h, w), ((0, 0), (PAD, PAD), (PAD, PAD)))
    w_flat = conv_w.reshape(-1).astype(jnp.float32)        # (2*K*K,) = (98,)
    b_flat = conv_b.reshape(-1).astype(jnp.float32)        # (1,)

    pad_map_bytes = _pad_up(hp, 8) * _pad_up(wp, 128) * 4
    b2_cap = n if n < 2 else max(1, n // 2)                # keep both TCs busy on v7x
    b2_cap = min(b2_cap, max(1, (2 << 20) // pad_map_bytes))
    b_tile2 = _pick_tile(n, b2_cap)

    out = pl.pallas_call(
        _conv_kernel,
        out_shape=jax.ShapeDtypeStruct((n, h, w), jnp.float32),
        grid=(n // b_tile2,),
        in_specs=[
            pl.BlockSpec((b_tile2, hp, wp), lambda bi: (bi, 0, 0)),
            pl.BlockSpec((b_tile2, hp, wp), lambda bi: (bi, 0, 0)),
            pl.BlockSpec(memory_space=pltpu.SMEM),
            pl.BlockSpec(memory_space=pltpu.SMEM),
        ],
        out_specs=pl.BlockSpec((b_tile2, h, w), lambda bi: (bi, 0, 0)),
        compiler_params=pltpu.CompilerParams(
            dimension_semantics=("parallel",)),
    )(maxp, avgp, w_flat, b_flat)

    return out.reshape(n, 1, h, w)


# ------------------------------ reference ------------------------------------

def _reference(x, conv_w, conv_b):
    max_map = jnp.max(x, axis=1, keepdims=True)
    avg_map = jnp.mean(x, axis=1, keepdims=True)
    cat = jnp.concatenate([max_map, avg_map], axis=1)      # (N, 2, H, W)
    y = lax.conv_general_dilated(
        cat, conv_w, window_strides=(1, 1),
        padding=((PAD, PAD), (PAD, PAD)),
        dimension_numbers=("NCHW", "OIHW", "NCHW"))
    return jax.nn.sigmoid(y + conv_b.reshape(1, 1, 1, 1))


if __name__ == "__main__":
    N, C, H, W = 2, 4, 16, 16

    key = jax.random.PRNGKey(0)
    kx, kw_, kb, kx2 = jax.random.split(key, 4)

    x = jax.random.normal(kx, (N, C, H, W), dtype=jnp.float32)

    # Deterministic Conv2d(2, 1, 7) init (PyTorch-style uniform bound).
    fan_in = 2 * K * K
    bound = 1.0 / math.sqrt(fan_in)
    conv_w = jax.random.uniform(kw_, (1, 2, K, K), jnp.float32, -bound, bound)
    conv_b = jax.random.uniform(kb, (1,), jnp.float32, -bound, bound)

    ref = _reference(x, conv_w, conv_b)
    out = jax.block_until_ready(sam_forward(x, conv_w, conv_b))
    assert out.shape == (N, 1, H, W)
    assert jnp.allclose(out, ref, atol=1e-5, rtol=1e-5)

    # Multi-channel-step path: exercises the running max/sum accumulation
    # across grid steps (C=16 with a sublane-aligned c_tile=8, per-image tiles).
    C2 = 16
    x2 = jax.random.normal(kx2, (N, C2, H, W), dtype=jnp.float32)
    ref2 = _reference(x2, conv_w, conv_b)
    out2 = jax.block_until_ready(
        sam_forward(x2, conv_w, conv_b, b_tile=1, c_tile=8))
    assert jnp.allclose(out2, ref2, atol=1e-5, rtol=1e-5)

    print("KERNEL_OK")
</pallas_src>

<mosaic_0001>
module attributes {stable_mosaic.version = 11 : i64} {
  func.func @_reduce_kernel(%arg0: i32, %arg1: i32, %arg2: memref<1x4x256xf32, #tpu.memory_space<vmem>>, %arg3: memref<1x1x256xf32, #tpu.memory_space<vmem>>, %arg4: memref<1x1x256xf32, #tpu.memory_space<vmem>>) attributes {dimension_semantics = [#tpu.dimension_semantics<parallel>, #tpu.dimension_semantics<arbitrary>], iteration_bounds = array<i64: 2, 1>, scalar_prefetch = 0 : i64, scratch_operands = 0 : i64, tpu.core_type = #tpu.core_type<tc>, window_params = [{transform_indices = @transform_0, window_bounds = array<i64: 1, 4, 256>}, {transform_indices = @transform_1, window_bounds = array<i64: 1, 1, 256>}, {transform_indices = @transform_2, window_bounds = array<i64: 1, 1, 256>}]} {
    %c0 = arith.constant 0 : index
    %c0_0 = arith.constant 0 : index
    %c0_1 = arith.constant 0 : index
    %0 = vector.load %arg2[%c0, %c0_0, %c0_1] : memref<1x4x256xf32, #tpu.memory_space<vmem>>, vector<1x1x256xf32>
    %1 = vector.shape_cast %0 : vector<1x1x256xf32> to vector<1x256xf32>
    %c0_2 = arith.constant 0 : index
    %c1 = arith.constant 1 : index
    %c0_3 = arith.constant 0 : index
    %2 = vector.load %arg2[%c0_2, %c1, %c0_3] : memref<1x4x256xf32, #tpu.memory_space<vmem>>, vector<1x1x256xf32>
    %3 = vector.shape_cast %2 : vector<1x1x256xf32> to vector<1x256xf32>
    %4 = arith.maximumf %1, %3 : vector<1x256xf32>
    %5 = arith.addf %1, %3 : vector<1x256xf32>
    %c0_4 = arith.constant 0 : index
    %c2 = arith.constant 2 : index
    %c0_5 = arith.constant 0 : index
    %6 = vector.load %arg2[%c0_4, %c2, %c0_5] : memref<1x4x256xf32, #tpu.memory_space<vmem>>, vector<1x1x256xf32>
    %7 = vector.shape_cast %6 : vector<1x1x256xf32> to vector<1x256xf32>
    %8 = arith.maximumf %4, %7 : vector<1x256xf32>
    %9 = arith.addf %5, %7 : vector<1x256xf32>
    %c0_6 = arith.constant 0 : index
    %c3 = arith.constant 3 : index
    %c0_7 = arith.constant 0 : index
    %10 = vector.load %arg2[%c0_6, %c3, %c0_7] : memref<1x4x256xf32, #tpu.memory_space<vmem>>, vector<1x1x256xf32>
    %11 = vector.shape_cast %10 : vector<1x1x256xf32> to vector<1x256xf32>
    %12 = arith.maximumf %8, %11 : vector<1x256xf32>
    %13 = arith.addf %9, %11 : vector<1x256xf32>
    %c0_i32 = arith.constant 0 : i32
    %14 = arith.cmpi eq, %arg1, %c0_i32 : i32
    %15 = arith.extui %14 : i1 to i32
    %c0_i32_8 = arith.constant 0 : i32
    %16 = arith.cmpi ne, %15, %c0_i32_8 : i32
    scf.if %16 {
      %c0_13 = arith.constant 0 : index
      %c0_14 = arith.constant 0 : index
      %c0_15 = arith.constant 0 : index
      %23 = vector.load %arg3[%c0_13, %c0_14, %c0_15] : memref<1x1x256xf32, #tpu.memory_space<vmem>>, vector<1x1x256xf32>
      %24 = vector.shape_cast %23 : vector<1x1x256xf32> to vector<1x256xf32>
      %25 = vector.shape_cast %12 : vector<1x256xf32> to vector<1x1x256xf32>
      tpu.vector_store %arg3[%c0_13, %c0_14, %c0_15], %25 {strides = array<i32>} : memref<1x1x256xf32, #tpu.memory_space<vmem>>, vector<1x1x256xf32>,
      %c0_16 = arith.constant 0 : index
      %c0_17 = arith.constant 0 : index
      %c0_18 = arith.constant 0 : index
      %26 = vector.load %arg4[%c0_16, %c0_17, %c0_18] : memref<1x1x256xf32, #tpu.memory_space<vmem>>, vector<1x1x256xf32>
      %27 = vector.shape_cast %26 : vector<1x1x256xf32> to vector<1x256xf32>
      %28 = vector.shape_cast %13 : vector<1x256xf32> to vector<1x1x256xf32>
      tpu.vector_store %arg4[%c0_16, %c0_17, %c0_18], %28 {strides = array<i32>} : memref<1x1x256xf32, #tpu.memory_space<vmem>>, vector<1x1x256xf32>,
    } else {
    }
    %c0_i32_9 = arith.constant 0 : i32
    %17 = arith.cmpi sgt, %arg1, %c0_i32_9 : i32
    %18 = arith.extui %17 : i1 to i32
    %c0_i32_10 = arith.constant 0 : i32
    %19 = arith.cmpi ne, %18, %c0_i32_10 : i32
    scf.if %19 {
      %c0_13 = arith.constant 0 : index
      %c0_14 = arith.constant 0 : index
      %c0_15 = arith.constant 0 : index
      %23 = vector.load %arg3[%c0_13, %c0_14, %c0_15] : memref<1x1x256xf32, #tpu.memory_space<vmem>>, vector<1x1x256xf32>
      %24 = vector.shape_cast %23 : vector<1x1x256xf32> to vector<1x256xf32>
      %25 = arith.maximumf %24, %12 : vector<1x256xf32>
      %c0_16 = arith.constant 0 : index
      %c0_17 = arith.constant 0 : index
      %c0_18 = arith.constant 0 : index
      %26 = vector.load %arg3[%c0_16, %c0_17, %c0_18] : memref<1x1x256xf32, #tpu.memory_space<vmem>>, vector<1x1x256xf32>
      %27 = vector.shape_cast %26 : vector<1x1x256xf32> to vector<1x256xf32>
      %28 = vector.shape_cast %25 : vector<1x256xf32> to vector<1x1x256xf32>
      tpu.vector_store %arg3[%c0_16, %c0_17, %c0_18], %28 {strides = array<i32>} : memref<1x1x256xf32, #tpu.memory_space<vmem>>, vector<1x1x256xf32>,
      %c0_19 = arith.constant 0 : index
      %c0_20 = arith.constant 0 : index
      %c0_21 = arith.constant 0 : index
      %29 = vector.load %arg4[%c0_19, %c0_20, %c0_21] : memref<1x1x256xf32, #tpu.memory_space<vmem>>, vector<1x1x256xf32>
      %30 = vector.shape_cast %29 : vector<1x1x256xf32> to vector<1x256xf32>
      %31 = arith.addf %30, %13 : vector<1x256xf32>
      %c0_22 = arith.constant 0 : index
      %c0_23 = arith.constant 0 : index
      %c0_24 = arith.constant 0 : index
      %32 = vector.load %arg4[%c0_22, %c0_23, %c0_24] : memref<1x1x256xf32, #tpu.memory_space<vmem>>, vector<1x1x256xf32>
      %33 = vector.shape_cast %32 : vector<1x1x256xf32> to vector<1x256xf32>
      %34 = vector.shape_cast %31 : vector<1x256xf32> to vector<1x1x256xf32>
      tpu.vector_store %arg4[%c0_22, %c0_23, %c0_24], %34 {strides = array<i32>} : memref<1x1x256xf32, #tpu.memory_space<vmem>>, vector<1x1x256xf32>,
    } else {
    }
    %c0_i32_11 = arith.constant 0 : i32
    %20 = arith.cmpi eq, %arg1, %c0_i32_11 : i32
    %21 = arith.extui %20 : i1 to i32
    %c0_i32_12 = arith.constant 0 : i32
    %22 = arith.cmpi ne, %21, %c0_i32_12 : i32
    scf.if %22 {
      %c0_13 = arith.constant 0 : index
      %c0_14 = arith.constant 0 : index
      %c0_15 = arith.constant 0 : index
      %23 = vector.load %arg4[%c0_13, %c0_14, %c0_15] : memref<1x1x256xf32, #tpu.memory_space<vmem>>, vector<1x1x256xf32>
      %24 = vector.shape_cast %23 : vector<1x1x256xf32> to vector<1x256xf32>
      %cst = arith.constant 2.500000e-01 : f32
      %25 = vector.broadcast %cst : f32 to vector<1x256xf32>
      %26 = arith.mulf %24, %25 : vector<1x256xf32>
      %c0_16 = arith.constant 0 : index
      %c0_17 = arith.constant 0 : index
      %c0_18 = arith.constant 0 : index
      %27 = vector.load %arg4[%c0_16, %c0_17, %c0_18] : memref<1x1x256xf32, #tpu.memory_space<vmem>>, vector<1x1x256xf32>
      %28 = vector.shape_cast %27 : vector<1x1x256xf32> to vector<1x256xf32>
      %29 = vector.shape_cast %26 : vector<1x256xf32> to vector<1x1x256xf32>
      tpu.vector_store %arg4[%c0_16, %c0_17, %c0_18], %29 {strides = array<i32>} : memref<1x1x256xf32, #tpu.memory_space<vmem>>, vector<1x1x256xf32>,
    } else {
    }
    return
  }
  func.func @transform_0(%arg0: i32, %arg1: i32) -> (i32, i32, i32) {
    %c0_i32 = arith.constant 0 : i32
    %c0_i32_0 = arith.constant 0 : i32
    return %arg0, %arg1, %c0_i32 : i32, i32, i32
  }
  func.func @transform_1(%arg0: i32, %arg1: i32) -> (i32, i32, i32) {
    %c0_i32 = arith.constant 0 : i32
    %c0_i32_0 = arith.constant 0 : i32
    %c0_i32_1 = arith.constant 0 : i32
    return %arg0, %c0_i32, %c0_i32_0 : i32, i32, i32
  }
  func.func @transform_2(%arg0: i32, %arg1: i32) -> (i32, i32, i32) {
    %c0_i32 = arith.constant 0 : i32
    %c0_i32_0 = arith.constant 0 : i32
    %c0_i32_1 = arith.constant 0 : i32
    return %arg0, %c0_i32, %c0_i32_0 : i32, i32, i32
  }
}

</mosaic_0001>

<bundles_post_ra>
// kernel: tpu_custom_call.1
= control target key start
LH: loop header
LB: loop body
LE: loop exit
PB: predicated region body
PF: predicated region fallthrough
CT: control target
= control target key end

     0   :  { %8 = vsyncpa [#allocation3], 0  ;;  %s814_s0 = inlined_call_operand.hbm [shape: f32[2,4,256], index: 0, kind: input, shape index: {}]   ;;  %s815_s1 = inlined_call_operand.hbm [shape: f32[2,1,256], index: 1, kind: output, shape index: {0}]   ;;  %s816_s2 = inlined_call_operand.hbm [shape: f32[2,1,256], index: 2, kind: output, shape index: {1}]  }
   0x1   :  { %10 = vsyncpa [#allocation3 + $0x1], 0 }
   0x2   :  { %11 = vsyncpa [#allocation4], 0 }
   0x3   :  { %13 = vsyncpa [#allocation4 + $0x1], 0 }
   0x4   :  { %14 = vsyncpa [#allocation7], 0 }
   0x5   :  { %16 = vsyncpa [#allocation7 + $0x1], 0  ;;  %s631_s9 = smov 0   ;;  %s633_s10 = smov 0  }
   0x6   :  { %s635_s11 = smov 0   ;;  %s637_s12 = smov 0  }
   0x7   :  { %s639_s13 = smov 0   ;;  %s641_s14 = smov 0  }
   0x8 LB: > { %s381_s15 = sadd.s32 4294967295, %s611_s14   ;;  %s382_s16 = sadd.s32 4294967294, %s611_s14   ;;  %s611_s14 = sphi %s641_s14, %s22_s14   ;;  %s607_s13 = sphi %s639_s13, %s830_s13   ;;  %s603_s12 = sphi %s637_s12, %s829_s12   ;;  %s599_s11 = sphi %s635_s11, %s828_s11   ;;  %s595_s10 = sphi %s633_s10, %s827_s10   ;;  %s591_s9 = sphi %s631_s9, %s826_s9  }
   0x9   : > { %s34_s17 = sadd.s32 1, %s607_s13  ;;  %s43_s18 = sadd.s32 1, %s599_s11 }
   0xa   : > { %p36_p0 = scmp.ge.s32.totalorder %s34_s17, 2  ;;  %p50_p1 = scmp.ne.s32.totalorder %s599_s11, %s595_s10 }
   0xb   : > { %p51_p2 = scmp.eq.s32.totalorder %s611_s14, 0  ;;  %p56_p3 = scmp.ne.s32.totalorder %s595_s10, %s591_s9 }
   0xc   : > { %s832_s17 = smov (%p36_p0, %s34_s17), 0  ;;  %p57_p5 = scmp.eq.s32.totalorder %s381_s15, 0 }
   0xd   : > { %p672_p4 = por %p51_p2, %p50_p1  ;;  %s38_s20 = ssub.s32 %s607_s13, %s832_s17 }
   0xe   : > { %p80_p6 = scmp.eq.s32.totalorder %s381_s15, 1  ;;  %p41_p7 = scmp.eq.s32.totalorder %s38_s20, 0 }
   0xf   : > { %p678_p8 = por %p57_p5, %p56_p3  ;;  %p86_p10 = scmp.eq.s32.totalorder %s382_s16, 1 }
  0x10   : > { %p682_p9 = por %p80_p6, %p50_p1  ;;  %p423_p13 = scmp.lt.s32.totalorder %s611_s14, 2 }
  0x11   : > { %s687_s23 = scalar_select %p41_p7, %s599_s11, %s43_s18  }
  0x12   : > { %p689_p11 = por %p86_p10, %p56_p3  ;;  %s132_s25 = sand.u32 1, %s599_s11  }
  0x13   : > { %s385_s26 = sshll.u32 %s132_s25, 3  ;;  %s403_s27 = sshll.u32 %s607_s13, 7 }
  0x14   : > { %s820_s24 = scalar_select %p689_p11, 1, 0 }
  0x15   : > { %s144_s30 = scalar_lea.hbm %s814_s0, %s403_s27  ;;  %s136_s3 = scalar_lea.vmem [#allocation2], %s385_s26 }
  0x16   : > { %s146_s4 = sshll.u32 %s136_s3, 4  ;;  %p702_p0 = pnand %p423_p13, %p672_p4  ;;  %s147_s4 = int_to_ptr.vmem [resolvable:$true] %s146_s4 }
  0x17   : > { %p388_p1 = scmp.ge.s32.totalorder %s611_s14, 1  ;;  %p151_p2 = scmp.lt.s32.totalorder %s611_s14, 3 }
  0x18   : > { %s133_s6 = scalar_lea.sflag [#allocation3], %s132_s25  ;;  %p475_p3 = pneg %p702_p0 }
  0x19   : > { %s486_s7 = scalar_lea.vmem %s147_s4, 128  ;;  %s613_s8 = smov [#allocation2]  }
  0x1a   : > { %p487_p5 = scmp.ne.s32.totalorder %s147_s4, %s486_s7  ;;  %s491_s15 = sshll.u32 %s613_s8, 4  ;;  %s492_s15 = int_to_ptr.vmem [resolvable:$false] %s491_s15 }
  0x1b   : > { %s493_s16 = scalar_lea.vmem %s492_s15, 256  ;;  %p494_p10 = scmp.lt.s32.totalorder %s147_s4, %s492_s15 }
  0x1c   : > { %p489_p6 = pnand %p487_p5, %p475_p3  ;;  %p495_p12 = scmp.lt.s32.totalorder %s493_s16, %s486_s7 }
  0x1e   : > { %p490_p7 = pneg %p489_p6  ;;  %p496_p4 = por %p495_p12, %p494_p10 }
  0x20   : > { %p497_p13 = pnand %p496_p4, %p490_p7 }
  0x22   : > { %500 = shalt.err (!%p497_p13)
}
  0x23   : > { %415 = dma.hbm_to_vmem [thread:$0]  (!%p702_p0), %s144_s30, 128, %s147_s4, %s133_s6  }
  0x24   : > { %p152_p11 = pnand %p388_p1, %p151_p2 }
  0x25   : > { %s717_s18 = sand.u32 (!%p152_p11), 1, %s595_s10  }
  0x26   : > { %155 = sbr.rel (%p152_p11) target bundleno = 92 (0x5c), region = 24  ;;  %s389_s19 = sshll.u32 (!%p152_p11), %s717_s18, 3 }
  0x27   : > { %s158_s20 = scalar_lea.sflag (!%p152_p11), [#allocation3], %s717_s18  ;;  %s161_s25 = scalar_lea.vmem (!%p152_p11), [#allocation2], %s389_s19 }
  0x2b   : > { %578 = dma.done.wait (%p678_p8), %s158_s20, 128  }
  0x2c   : > { %580 = vsyncadd (%p678_p8), %s158_s20, 4294967168  ;;  %s390_s26 = sshll.u32 %s717_s18, 1  ;;  %v187_v0 = vld [vmem:[%s161_s25] ss:$4 sm:$0x3]  ;;  %v204_v2 = vlaneseq  ;;  %s404_s29 = sshll.u32 %s603_s12, 5 }
  0x2d   : > { %v392_v1 = vld [vmem:[%s161_s25 + $0x1] ss:$4 sm:$0x3]  ;;  %v393_v4 = vld [vmem:[%s161_s25 + $0x2] ss:$4 sm:$0x3]  ;;  %s738_s3 = scalar_lea.hbm %s815_s1, %s404_s29 }
  0x2e   : > { %v191_v3 = vadd.f32 %v392_v1, %v187_v0  ;;  %v190_v5 = vmax.f32 %v187_v0, %v392_v1  ;;  %v394_v6 = vld [vmem:[%s161_s25 + $0x3] ss:$4 sm:$0x3]  ;;  %s179_s27 = scalar_lea.vmem [#allocation5], %s390_s26  ;;  %vm727_vm0 = vcmp.lt.s32.totalorder %v204_v2, 256  ;;  %s740_s4 = scalar_lea.vmem [#allocation6], %s390_s26 }
  0x2f   : > { %s254_s28 = sshll.u32 %s179_s27, 4  ;;  %s235_s5 = scalar_lea.sflag [#allocation4], %s717_s18  ;;  %s731_s28 = int_to_ptr.vmem [resolvable:$true] %s254_s28 }
  0x30   : > { %v195_v7 = vadd.f32 %v393_v4, %v191_v3  ;;  %v194_v8 = vmax.f32 %v190_v5, %v393_v4  ;;  %s501_s6 = scalar_lea.vmem %s731_s28, 32  ;;  %s614_s7 = smov [#allocation5]  }
  0x31   : > { %p502_p8 = scmp.ne.s32.totalorder %s731_s28, %s501_s6  ;;  %s505_s8 = sshll.u32 %s614_s7, 4  ;;  %s506_s8 = int_to_ptr.vmem [resolvable:$false] %s505_s8 }
  0x32   : > { %v199_v10 = vadd.f32 %v394_v6, %v195_v7  ;;  %v198_v11 = vmax.f32 %v194_v8, %v394_v6  ;;  %s507_s15 = scalar_lea.vmem %s506_s8, 64  ;;  %p508_p0 = scmp.lt.s32.totalorder %s731_s28, %s506_s8 }
  0x33   : > { %p503_p11 = pnand %p502_p8, %p682_p9  ;;  %p509_p1 = scmp.lt.s32.totalorder %s507_s15, %s501_s6 }
  0x34   : > { %209 = vst.msk [vmem:[%s740_s4] sm:$0x3] %vm727_vm0, %v199_v10  ;;  %208 = vst.msk [vmem:[%s179_s27] sm:$0x3] %vm727_vm0, %v198_v11 }
  0x35   : > { %p504_p12 = pneg %p503_p11  ;;  %p510_p2 = por %p509_p1, %p508_p0 }
  0x37   : > { %p511_p3 = pnand %p510_p2, %p504_p12 }
  0x39   : > { %514 = shalt.err (!%p511_p3)
}
  0x3a   : > { %s515_s16 = scalar_lea.hbm %s738_s3, 32  ;;  %s519_s25 = scalar_lea.hbm %s815_s1, 64 }
  0x3b   : > { %p516_p5 = scmp.ne.s32.totalorder %s738_s3, %s515_s16  ;;  %p520_p10 = scmp.lt.s32.totalorder %s738_s3, %s815_s1 }
  0x3c   : > { %p521_p4 = scmp.lt.s32.totalorder %s519_s25, %s515_s16 }
  0x3d   : > { %p517_p6 = pnand %p516_p5, %p682_p9 }
  0x3e   : > { %p522_p13 = por %p521_p4, %p520_p10 }
  0x3f   : > { %p518_p7 = pneg %p517_p6 }
  0x41   : > { %p523_p8 = pnand %p522_p13, %p518_p7 }
  0x43   : > { %526 = shalt.err (!%p523_p8)
}
  0x44   : > { %408 = dma.vmem_to_hbm [thread:$0]  (%p682_p9), %s731_s28, 32, %s738_s3, %s235_s5   ;;  %v227_v12 = vld [vmem:[%s740_s4] sm:$0x3] }
  0x45   : > { %s268_s21 = sshll.u32 %s740_s4, 4  ;;  %v228_v13 = vmul.f32 0.25, %v227_v12  ;;  %s266_s7 = scalar_lea.hbm %s816_s2, %s404_s29  ;;  %s269_s21 = int_to_ptr.vmem [resolvable:$true] %s268_s21 }
  0x46   : > { %s240_s8 = scalar_lea.sflag [#allocation7], %s717_s18  ;;  %s527_s15 = scalar_lea.vmem %s269_s21, 32 }
  0x47   : > { %233 = vst.msk [vmem:[%s740_s4] sm:$0x3] %vm727_vm0, %v228_v13  ;;  %p528_p11 = scmp.ne.s32.totalorder %s269_s21, %s527_s15  ;;  %s615_s16 = smov [#allocation6]  }
  0x48   : > { %s531_s28 = sshll.u32 %s615_s16, 4  ;;  %s532_s28 = int_to_ptr.vmem [resolvable:$false] %s531_s28 }
  0x49   : > { %p529_p12 = pnand %p528_p11, %p682_p9  ;;  %s533_s3 = scalar_lea.vmem %s532_s28, 64 }
  0x4a   : > { %p534_p1 = scmp.lt.s32.totalorder %s269_s21, %s532_s28  ;;  %p535_p2 = scmp.lt.s32.totalorder %s533_s3, %s527_s15 }
  0x4b   : > { %p530_p0 = pneg %p529_p12 }
  0x4c   : > { %p536_p3 = por %p535_p2, %p534_p1 }
  0x4e   : > { %p537_p5 = pnand %p536_p3, %p530_p0 }
  0x50   : > { %540 = shalt.err (!%p537_p5)
}
  0x51   : > { %s541_s12 = scalar_lea.hbm %s266_s7, 32  ;;  %s545_s4 = scalar_lea.hbm %s816_s2, 64 }
  0x52   : > { %p542_p6 = scmp.ne.s32.totalorder %s266_s7, %s541_s12  ;;  %p546_p4 = scmp.lt.s32.totalorder %s266_s7, %s816_s2 }
  0x53   : > { %p547_p13 = scmp.lt.s32.totalorder %s545_s4, %s541_s12 }
  0x54   : > { %p543_p7 = pnand %p542_p6, %p682_p9 }
  0x55   : > { %p548_p8 = por %p547_p13, %p546_p4 }
  0x56   : > { %p544_p10 = pneg %p543_p7 }
  0x58   : > { %p549_p11 = pnand %p548_p8, %p544_p10 }
  0x5a   : > { %552 = shalt.err (!%p549_p11)
}
  0x5b   : > { %409 = dma.vmem_to_hbm [thread:$0]  (%p682_p9), %s269_s21, 32, %s266_s7, %s240_s8  }
  0x5c PF: > { %s280_s20 = sand.u32 1, %s591_s9   ;;  %p824_p12 = scmp.ne.s32.totalorder %s820_s24, 0 }
  0x5d   : > { %p825_p0 = scmp.ge.s32.totalorder %s611_s14, 2  ;;  %s281_s25 = scalar_lea.sflag [#allocation4], %s280_s20 }
  0x5f   : > { %p417_p1 = pnand %p825_p0, %p824_p12 }
  0x61   : > { %p418_p2 = pneg %p417_p1 }
  0x63   : > { %582 = dma.done.wait (%p418_p2), %s281_s25, 32  }
  0x64   : > { %584 = vsyncadd (%p418_p2), %s281_s25, 4294967264  ;;  %s290_s26 = scalar_lea.sflag [#allocation7], %s280_s20 }
  0x65   : > { %586 = dma.done.wait (%p418_p2), %s290_s26, 32  }
  0x66   : > { %588 = vsyncadd (%p418_p2), %s290_s26, 4294967264  ;;  %s22_s14 = sadd.s32 1, %s611_s14   ;;  %s826_s9 = smov %s595_s10 }
  0x67   : > { %p19_p3 = scmp.ge.s32.totalorder %s22_s14, 4   ;;  %s827_s10 = smov %s599_s11 }
  0x68   : > { %s828_s11 = smov %s687_s23  ;;  %s829_s12 = smov %s607_s13 }
  0x69   : > { %s830_s13 = smov %s832_s17  ;;  %21 = sbr.rel (!%p19_p3) target bundleno = 8 (0x8), region = 101 }
  0x6e   :  { %295 = vsyncpa [#allocation3], 1 }
  0x6f   :  { %297 = vsyncpa [#allocation3 + $0x1], 1 }
  0x70   :  { %298 = vsyncpa [#allocation4], 1 }
  0x71   :  { %300 = vsyncpa [#allocation4 + $0x1], 1 }
  0x72   :  { %301 = vsyncpa [#allocation7], 1 }
  0x73   :  { %303 = vsyncpa [#allocation7 + $0x1], 1 }

</bundles_post_ra>
